<compile_context>
chip_gen: v6e
topology: v6e:2x2x1
jax: 0.10.0
libtpu: 0.0.40
codegen_flags: <defaults>
</compile_context>

<pallas_src>
import jax
import jax.numpy as jnp
from jax import lax
from jax.experimental import pallas as pl
from jax.experimental.pallas import tpu as pltpu

_TARGET_BLOCK_BYTES = 4 * 1024 * 1024   # per input per block (v6e/v7x sweet spot)
_VMEM_LIMIT_BYTES = 40 * 1024 * 1024    # 3 inputs x 2 buffers x 4 MiB + headroom
_NUM_CORE_SPLITS = 2                    # v7x has 2 TCs; harmless on v5e/v6e


def _make_f1_partial_kernel(steps_per_core, block_rows, n_rows, acc_dtype):
    """Kernel producing per-core (TP, FP+FN) partial sums."""

    def kernel(tp_ref, fp_ref, fn_ref, out_ref, acc_ref):
        i = pl.program_id(1)  # streaming ("arbitrary") axis

        @pl.when(i == 0)
        def _init():
            acc_ref[0] = jnp.zeros((), acc_dtype)
            acc_ref[1] = jnp.zeros((), acc_dtype)

        # Unclamped global block index -> global row ids.  Rows >= n_rows are
        # either the ragged tail of the last block or a clamped dummy block
        # (odd block count split over 2 cores); both are zeroed by the mask.
        gb = pl.program_id(0) * steps_per_core + i
        row0 = gb * block_rows
        rows = lax.broadcasted_iota(jnp.int32, tp_ref.shape, 0) + row0
        valid = rows < n_rows

        # Widen in-kernel (inputs travel in native dtype); cast fp/fn BEFORE
        # the VPU add so narrow integer inputs cannot overflow.
        tp_v = jnp.where(valid, tp_ref[...], 0).astype(acc_dtype)
        fpfn_v = jnp.where(
            valid, fp_ref[...].astype(acc_dtype) + fn_ref[...].astype(acc_dtype), 0
        )

        acc_ref[0] += jnp.sum(tp_v, dtype=acc_dtype)
        acc_ref[1] += jnp.sum(fpfn_v, dtype=acc_dtype)

        @pl.when(i == steps_per_core - 1)
        def _finalize():
            # Write partials into this core's lane-dense (8, 128) output tile:
            # sublane 0 = TP partial, sublane 1 = FP+FN partial.
            sub = lax.broadcasted_iota(jnp.int32, (8, 128), 0)
            tp_s = acc_ref[0].astype(jnp.float32)
            fpfn_s = acc_ref[1].astype(jnp.float32)
            out_ref[0] = jnp.where(sub == 0, tp_s, jnp.where(sub == 1, fpfn_s, 0.0))

    return kernel


def f1_score_micro(tp, fp, fn, tn=None, *, target_block_bytes=_TARGET_BLOCK_BYTES):
    """Micro-averaged F1 score computed with a tiled Pallas TPU kernel.

    Args:
      tp, fp, fn, tn: (batch, num_classes) count arrays (int or float).
        tn is accepted to match the smp API but is never read or DMA'd.
      target_block_bytes: per-input streaming block size (per-generation knob;
        4 MiB default is good for v6e/v7x, 1-2 MiB is plenty for v5e).
    Returns:
      scalar float32 F1 score.
    """
    assert tp.shape == fp.shape == fn.shape
    del tn  # micro-F1 never uses tn -> skip its DMA entirely.

    def as2d(x):
        # Contiguous reshapes only (no data movement).
        if x.ndim == 2:
            return x
        if x.ndim == 1:
            return x.reshape(1, -1)
        return x.reshape(x.shape[0], -1)

    tp2, fp2, fn2 = as2d(tp), as2d(fp), as2d(fn)
    B, C = tp2.shape
    n = B * C
    assert n > 0, "empty input"

    # Exact integer accumulation for count inputs; float32 path for floats.
    # NOTE: int32 accumulation overflows past ~2.1e9 total counts per core.
    if any(jnp.issubdtype(x.dtype, jnp.floating) for x in (tp, fp, fn)):
        acc_dtype = jnp.float32
    else:
        acc_dtype = jnp.int32

    itemsize = max(x.dtype.itemsize for x in (tp2, fp2, fn2))
    if B <= 8:
        block_rows = B                     # full dim: always a legal block dim
    else:
        budget_rows = max(target_block_bytes // (C * itemsize), 8)
        block_rows = min((budget_rows // 8) * 8, pl.cdiv(B, 8) * 8)
    total_blocks = pl.cdiv(B, block_rows)
    steps = pl.cdiv(total_blocks, _NUM_CORE_SPLITS)

    # Clamp the block index so dummy steps (odd block count) never start an
    # out-of-bounds DMA; their contribution is zeroed by the in-kernel mask
    # (which uses the UNclamped index).
    def in_idx(c, i):
        return (jnp.minimum(c * steps + i, total_blocks - 1), 0)

    blk = pl.BlockSpec((block_rows, C), in_idx)
    kernel = _make_f1_partial_kernel(steps, block_rows, B, acc_dtype)

    bytes_accessed = sum(int(x.size) * x.dtype.itemsize for x in (tp2, fp2, fn2))
    cost = pl.CostEstimate(
        flops=3 * n,
        transcendentals=0,
        bytes_accessed=bytes_accessed + _NUM_CORE_SPLITS * 8 * 128 * 4,
    )

    parts = pl.pallas_call(
        kernel,
        out_shape=jax.ShapeDtypeStruct((_NUM_CORE_SPLITS, 8, 128), jnp.float32),
        grid_spec=pltpu.PrefetchScalarGridSpec(
            num_scalar_prefetch=0,
            grid=(_NUM_CORE_SPLITS, steps),
            in_specs=[blk, blk, blk],
            out_specs=pl.BlockSpec((1, 8, 128), lambda c, i: (c, 0, 0)),
            scratch_shapes=[pltpu.SMEM((2,), acc_dtype)],
        ),
        compiler_params=pltpu.CompilerParams(
            dimension_semantics=("parallel", "arbitrary"),
            vmem_limit_bytes=_VMEM_LIMIT_BYTES,
        ),
        cost_estimate=cost,
    )(tp2, fp2, fn2)

    # Tiny final combine (4 flops) in the wrapper: sum the per-core partials
    # and apply f1 = 2*TP / (2*TP + FP + FN), with 0/0 -> 0.
    tp_total = parts[:, 0, 0].sum()
    fpfn_total = parts[:, 1, 0].sum()
    num = 2.0 * tp_total
    den = num + fpfn_total
    return num / jnp.where(den > 0.0, den, 1.0)


def _ref_f1(tp, fp, fn):
    tp_s = jnp.sum(tp).astype(jnp.float32)
    fp_s = jnp.sum(fp).astype(jnp.float32)
    fn_s = jnp.sum(fn).astype(jnp.float32)
    den = 2.0 * tp_s + fp_s + fn_s
    return jnp.where(den > 0, 2.0 * tp_s / jnp.where(den > 0, den, 1.0), 0.0)


if __name__ == "__main__":
    key = jax.random.PRNGKey(0)
    k_tp, k_fp, k_fn, k_tn = jax.random.split(key, 4)

    # Typical (batch, num_classes) stats shape for this metric.
    batch, num_classes = 2, 4
    tp = jax.random.randint(k_tp, (batch, num_classes), 0, 100, dtype=jnp.int32)
    fp = jax.random.randint(k_fp, (batch, num_classes), 0, 100, dtype=jnp.int32)
    fn = jax.random.randint(k_fn, (batch, num_classes), 0, 100, dtype=jnp.int32)
    tn = jax.random.randint(k_tn, (batch, num_classes), 0, 100, dtype=jnp.int32)

    result = f1_score_micro(tp, fp, fn, tn)
    jax.block_until_ready(result)
    ref = _ref_f1(tp, fp, fn)
    assert jnp.allclose(result, ref, rtol=1e-6, atol=1e-6), (result, ref)

    # All-zero stats: 0/0 -> 0 (smp zero_division behavior).
    z = jnp.zeros((batch, num_classes), jnp.int32)
    r0 = f1_score_micro(z, z, z, z)
    jax.block_until_ready(r0)
    assert jnp.allclose(r0, 0.0), r0

    # Larger case: single 2 MiB block per input, both core-splits exercised.
    k2 = jax.random.split(jax.random.PRNGKey(1), 3)
    big = (128, 4096)
    tp_b = jax.random.randint(k2[0], big, 0, 100, dtype=jnp.int32)
    fp_b = jax.random.randint(k2[1], big, 0, 100, dtype=jnp.int32)
    fn_b = jax.random.randint(k2[2], big, 0, 100, dtype=jnp.int32)
    r_b = f1_score_micro(tp_b, fp_b, fn_b, jnp.zeros(big, jnp.int32))
    jax.block_until_ready(r_b)
    assert jnp.allclose(r_b, _ref_f1(tp_b, fp_b, fn_b), rtol=1e-6, atol=1e-6)

    # Ragged / multi-step / dummy-block path: 1000 rows with 80-row blocks ->
    # 13 blocks, 7 steps per core, ragged last block, one masked dummy step.
    k3 = jax.random.split(jax.random.PRNGKey(2), 3)
    odd = (1000, 384)
    tp_o = jax.random.randint(k3[0], odd, 0, 100, dtype=jnp.int32)
    fp_o = jax.random.randint(k3[1], odd, 0, 100, dtype=jnp.int32)
    fn_o = jax.random.randint(k3[2], odd, 0, 100, dtype=jnp.int32)
    r_o = f1_score_micro(tp_o, fp_o, fn_o, None, target_block_bytes=128 * 1024)
    jax.block_until_ready(r_o)
    assert jnp.allclose(r_o, _ref_f1(tp_o, fp_o, fn_o), rtol=1e-6, atol=1e-6)

    print("KERNEL_OK")
</pallas_src>

<mosaic_0001>
module attributes {stable_mosaic.version = 11 : i64} {
  func.func @kernel(%arg0: i32, %arg1: i32, %arg2: memref<2x4xi32, #tpu.memory_space<vmem>>, %arg3: memref<2x4xi32, #tpu.memory_space<vmem>>, %arg4: memref<2x4xi32, #tpu.memory_space<vmem>>, %arg5: memref<1x8x128xf32, #tpu.memory_space<vmem>>, %arg6: memref<2xi32, #tpu.memory_space<smem>>) attributes {dimension_semantics = [#tpu.dimension_semantics<parallel>, #tpu.dimension_semantics<arbitrary>], iteration_bounds = array<i64: 2, 1>, scalar_prefetch = 0 : i64, scratch_operands = 1 : i64, tpu.core_type = #tpu.core_type<tc>, window_params = [{transform_indices = @transform_0, window_bounds = array<i64: 2, 4>}, {transform_indices = @transform_1, window_bounds = array<i64: 2, 4>}, {transform_indices = @transform_2, window_bounds = array<i64: 2, 4>}, {transform_indices = @transform_3, window_bounds = array<i64: 1, 8, 128>}]} {
    %c0_i32 = arith.constant 0 : i32
    %0 = arith.cmpi eq, %arg1, %c0_i32 : i32
    %1 = arith.extui %0 : i1 to i32
    %c0_i32_0 = arith.constant 0 : i32
    %2 = arith.cmpi ne, %1, %c0_i32_0 : i32
    scf.if %2 {
      %c0_i32_15 = arith.constant 0 : i32
      %c0_16 = arith.constant 0 : index
      %36 = memref.load %arg6[%c0_16] : memref<2xi32, #tpu.memory_space<smem>>
      memref.store %c0_i32_15, %arg6[%c0_16] : memref<2xi32, #tpu.memory_space<smem>>
      %c0_i32_17 = arith.constant 0 : i32
      %c1_18 = arith.constant 1 : index
      %37 = memref.load %arg6[%c1_18] : memref<2xi32, #tpu.memory_space<smem>>
      memref.store %c0_i32_17, %arg6[%c1_18] : memref<2xi32, #tpu.memory_space<smem>>
    } else {
    }
    %c1_i32 = arith.constant 1 : i32
    %3 = arith.muli %arg0, %c1_i32 : i32
    %4 = arith.addi %3, %arg1 : i32
    %c2_i32 = arith.constant 2 : i32
    %5 = arith.muli %4, %c2_i32 : i32
    %6 = tpu.iota {dimensions = array<i32: 0>} : vector<2x4xi32>
    %7 = vector.broadcast %5 : i32 to vector<2x4xi32>
    %8 = arith.addi %6, %7 : vector<2x4xi32>
    %c2_i32_1 = arith.constant 2 : i32
    %9 = vector.broadcast %c2_i32_1 : i32 to vector<2x4xi32>
    %10 = arith.cmpi slt, %8, %9 : vector<2x4xi32>
    %c0 = arith.constant 0 : index
    %c0_2 = arith.constant 0 : index
    %11 = vector.load %arg2[%c0, %c0_2] : memref<2x4xi32, #tpu.memory_space<vmem>>, vector<2x4xi32>
    %c0_i32_3 = arith.constant 0 : i32
    %12 = vector.broadcast %c0_i32_3 : i32 to vector<2x4xi32>
    %13 = arith.select %10, %11, %12 : vector<2x4xi1>, vector<2x4xi32>
    %c0_4 = arith.constant 0 : index
    %c0_5 = arith.constant 0 : index
    %14 = vector.load %arg3[%c0_4, %c0_5] : memref<2x4xi32, #tpu.memory_space<vmem>>, vector<2x4xi32>
    %c0_6 = arith.constant 0 : index
    %c0_7 = arith.constant 0 : index
    %15 = vector.load %arg4[%c0_6, %c0_7] : memref<2x4xi32, #tpu.memory_space<vmem>>, vector<2x4xi32>
    %16 = arith.addi %14, %15 : vector<2x4xi32>
    %c0_i32_8 = arith.constant 0 : i32
    %17 = vector.broadcast %c0_i32_8 : i32 to vector<2x4xi32>
    %18 = arith.select %10, %16, %17 : vector<2x4xi1>, vector<2x4xi32>
    %c0_9 = arith.constant 0 : index
    %19 = memref.load %arg6[%c0_9] : memref<2xi32, #tpu.memory_space<smem>>
    %20 = vector.shape_cast %13 : vector<2x4xi32> to vector<1x2x4xi32>
    %cst = arith.constant dense<0> : vector<1xi32>
    %21 = vector.multi_reduction <add>, %20, %cst [1, 2] : vector<1x2x4xi32> to vector<1xi32>
    %22 = vector.shape_cast %21 : vector<1xi32> to vector<1x1x1xi32>
    %23 = vector.extract %22[0, 0, 0] : i32 from vector<1x1x1xi32>
    %24 = arith.addi %19, %23 : i32
    %c0_10 = arith.constant 0 : index
    %25 = memref.load %arg6[%c0_10] : memref<2xi32, #tpu.memory_space<smem>>
    memref.store %24, %arg6[%c0_10] : memref<2xi32, #tpu.memory_space<smem>>
    %c1 = arith.constant 1 : index
    %26 = memref.load %arg6[%c1] : memref<2xi32, #tpu.memory_space<smem>>
    %27 = vector.shape_cast %18 : vector<2x4xi32> to vector<1x2x4xi32>
    %cst_11 = arith.constant dense<0> : vector<1xi32>
    %28 = vector.multi_reduction <add>, %27, %cst_11 [1, 2] : vector<1x2x4xi32> to vector<1xi32>
    %29 = vector.shape_cast %28 : vector<1xi32> to vector<1x1x1xi32>
    %30 = vector.extract %29[0, 0, 0] : i32 from vector<1x1x1xi32>
    %31 = arith.addi %26, %30 : i32
    %c1_12 = arith.constant 1 : index
    %32 = memref.load %arg6[%c1_12] : memref<2xi32, #tpu.memory_space<smem>>
    memref.store %31, %arg6[%c1_12] : memref<2xi32, #tpu.memory_space<smem>>
    %c0_i32_13 = arith.constant 0 : i32
    %33 = arith.cmpi eq, %arg1, %c0_i32_13 : i32
    %34 = arith.extui %33 : i1 to i32
    %c0_i32_14 = arith.constant 0 : i32
    %35 = arith.cmpi ne, %34, %c0_i32_14 : i32
    scf.if %35 {
      %36 = tpu.iota {dimensions = array<i32: 0>} : vector<8x128xi32>
      %c0_15 = arith.constant 0 : index
      %37 = memref.load %arg6[%c0_15] : memref<2xi32, #tpu.memory_space<smem>>
      %38 = arith.sitofp %37 : i32 to f32
      %c1_16 = arith.constant 1 : index
      %39 = memref.load %arg6[%c1_16] : memref<2xi32, #tpu.memory_space<smem>>
      %40 = arith.sitofp %39 : i32 to f32
      %c0_i32_17 = arith.constant 0 : i32
      %41 = vector.broadcast %c0_i32_17 : i32 to vector<8x128xi32>
      %42 = arith.cmpi eq, %36, %41 : vector<8x128xi32>
      %c1_i32_18 = arith.constant 1 : i32
      %43 = vector.broadcast %c1_i32_18 : i32 to vector<8x128xi32>
      %44 = arith.cmpi eq, %36, %43 : vector<8x128xi32>
      %cst_19 = arith.constant 0.000000e+00 : f32
      %45 = vector.broadcast %40 : f32 to vector<8x128xf32>
      %46 = vector.broadcast %cst_19 : f32 to vector<8x128xf32>
      %47 = arith.select %44, %45, %46 : vector<8x128xi1>, vector<8x128xf32>
      %48 = vector.broadcast %38 : f32 to vector<8x128xf32>
      %49 = arith.select %42, %48, %47 : vector<8x128xi1>, vector<8x128xf32>
      %c0_20 = arith.constant 0 : index
      %c0_21 = arith.constant 0 : index
      %c0_22 = arith.constant 0 : index
      %50 = vector.load %arg5[%c0_20, %c0_21, %c0_22] : memref<1x8x128xf32, #tpu.memory_space<vmem>>, vector<1x8x128xf32>
      %51 = vector.shape_cast %50 : vector<1x8x128xf32> to vector<8x128xf32>
      %52 = vector.shape_cast %49 : vector<8x128xf32> to vector<1x8x128xf32>
      tpu.vector_store %arg5[%c0_20, %c0_21, %c0_22], %52 {strides = array<i32>} : memref<1x8x128xf32, #tpu.memory_space<vmem>>, vector<1x8x128xf32>,
    } else {
    }
    return
  }
  func.func @transform_0(%arg0: i32, %arg1: i32) -> (i32, i32) {
    %c1_i32 = arith.constant 1 : i32
    %0 = arith.muli %arg0, %c1_i32 : i32
    %1 = arith.addi %0, %arg1 : i32
    %c0_i32 = arith.constant 0 : i32
    %2 = arith.minsi %1, %c0_i32 : i32
    %c0_i32_0 = arith.constant 0 : i32
    %c0_i32_1 = arith.constant 0 : i32
    return %2, %c0_i32_0 : i32, i32
  }
  func.func @transform_1(%arg0: i32, %arg1: i32) -> (i32, i32) {
    %c1_i32 = arith.constant 1 : i32
    %0 = arith.muli %arg0, %c1_i32 : i32
    %1 = arith.addi %0, %arg1 : i32
    %c0_i32 = arith.constant 0 : i32
    %2 = arith.minsi %1, %c0_i32 : i32
    %c0_i32_0 = arith.constant 0 : i32
    %c0_i32_1 = arith.constant 0 : i32
    return %2, %c0_i32_0 : i32, i32
  }
  func.func @transform_2(%arg0: i32, %arg1: i32) -> (i32, i32) {
    %c1_i32 = arith.constant 1 : i32
    %0 = arith.muli %arg0, %c1_i32 : i32
    %1 = arith.addi %0, %arg1 : i32
    %c0_i32 = arith.constant 0 : i32
    %2 = arith.minsi %1, %c0_i32 : i32
    %c0_i32_0 = arith.constant 0 : i32
    %c0_i32_1 = arith.constant 0 : i32
    return %2, %c0_i32_0 : i32, i32
  }
  func.func @transform_3(%arg0: i32, %arg1: i32) -> (i32, i32, i32) {
    %c0_i32 = arith.constant 0 : i32
    %c0_i32_0 = arith.constant 0 : i32
    %c0_i32_1 = arith.constant 0 : i32
    return %arg0, %c0_i32, %c0_i32_0 : i32, i32, i32
  }
}

</mosaic_0001>

<bundles_post_ra>
// kernel: tpu_custom_call.1
= control target key start
LH: loop header
LB: loop body
LE: loop exit
PB: predicated region body
PF: predicated region fallthrough
CT: control target
= control target key end

     0   :  { %8 = vsyncpa [#allocation4], 0  ;;  %s1011_s0 = inlined_call_operand.hbm [shape: s32[2,4], index: 0, kind: input, shape index: {}]   ;;  %s1012_s1 = inlined_call_operand.hbm [shape: s32[2,4], index: 1, kind: input, shape index: {}]   ;;  %s1013_s2 = inlined_call_operand.vmem [shape: s32[2,4], index: 2, kind: input, shape index: {}]   ;;  %s1014_s3 = inlined_call_operand.hbm [shape: f32[2,8,128], index: 3, kind: output, shape index: {}]  }
   0x1   :  { %10 = vsyncpa [#allocation4 + $0x1], 0 }
   0x2   :  { %11 = vsyncpa [#allocation7], 0 }
   0x3   :  { %13 = vsyncpa [#allocation7 + $0x1], 0 }
   0x4   :  { %14 = vsyncpa [#allocation5], 0 }
   0x5   :  { %16 = vsyncpa [#allocation5 + $0x1], 0  ;;  %s812_s12 = smov 0   ;;  %s814_s13 = smov 0  }
   0x6   :  { %s816_s14 = smov 0   ;;  %s818_s15 = smov 0  }
   0x7   :  { %s820_s16 = smov 0   ;;  %s822_s17 = smov 0  }
   0x8   :  { %s824_s18 = smov 0   ;;  %s826_s19 = smov 0  }
   0x9 LB: > { %s508_s20 = sadd.s32 4294967295, %s787_s19   ;;  %s509_s21 = sadd.s32 4294967294, %s787_s19   ;;  %s787_s19 = sphi %s826_s19, %s22_s19   ;;  %s783_s18 = sphi %s824_s18, %s1035_s18   ;;  %s779_s17 = sphi %s822_s17, %s1034_s17   ;;  %s775_s16 = sphi %s820_s16, %s1001_s16   ;;  %s771_s15 = sphi %s818_s15, %s1033_s15   ;;  %s767_s14 = sphi %s816_s14, %s1032_s14   ;;  %s763_s13 = sphi %s814_s13, %s1031_s13   ;;  %s759_s12 = sphi %s812_s12, %s1030_s12  }
   0xa   : > { %s34_s22 = sadd.s32 1, %s783_s18  ;;  %p756_p1 = scmp.ne.s32.totalorder %s775_s16, 0 }
   0xb   : > { %p36_p0 = scmp.ge.s32.totalorder %s34_s22, 2  ;;  %p55_p2 = scmp.eq.s32.totalorder %s787_s19, 0 }
   0xc   : > { %p60_p3 = scmp.ne.s32.totalorder %s775_s16, %s771_s15  ;;  %p61_p5 = scmp.eq.s32.totalorder %s508_s20, 0 }
   0xd   : > { %s1037_s22 = smov (%p36_p0, %s34_s22), 0  ;;  %p858_p4 = por %p756_p1, %p55_p2 }
   0xe   : > { %p862_p6 = por %p61_p5, %p60_p3  ;;  %s134_s25 = ssub.s32 %s783_s18, %s1037_s22 }
   0xf   : > { %p135_p7 = scmp.eq.s32.totalorder %s134_s25, 0  ;;  %s137_s26 = sadd.s32 1, %s767_s14 }
  0x10   : > { %s1018_s24 = scalar_select %p862_p6, 1, 0 }
  0x11   : > { %s870_s27 = scalar_select %p135_p7, %s767_s14, %s137_s26  }
  0x12   : > { %p147_p8 = scmp.ne.s32.totalorder %s767_s14, %s763_s13  ;;  %p148_p9 = scmp.eq.s32.totalorder %s508_s20, 1 }
  0x13   : > { %p153_p10 = scmp.ne.s32.totalorder %s763_s13, %s759_s12  ;;  %p154_p11 = scmp.eq.s32.totalorder %s509_s21, 1 }
  0x14   : > { %p876_p12 = por %p148_p9, %p147_p8  ;;  %p552_p1 = scmp.lt.s32.totalorder %s787_s19, 2 }
  0x15   : > { %p881_p0 = por %p154_p11, %p153_p10  ;;  %s789_s30 = smov [#allocation3]  }
  0x16   : > { %s1019_s28 = scalar_select %p876_p12, 1, 0 }
  0x17   : > { %s1020_s29 = scalar_select %p881_p0, 1, 0 }
  0x18   : > { %s188_s4 = sshll.u32 %s789_s30, 4  ;;  %p888_p2 = pnand %p552_p1, %p858_p4  ;;  %s189_s4 = int_to_ptr.vmem [resolvable:$true] %s188_s4 }
  0x19   : > { %s626_s8 = scalar_lea.hbm %s1011_s0, 32 }
  0x1a   : > { %p627_p7 = scmp.ne.s32.totalorder %s1011_s0, %s626_s8  ;;  %p628_p8 = pneg %p888_p2 }
  0x1b   : > { %p633_p10 = scmp.lt.s32.totalorder %s626_s8, %s626_s8 }
  0x1c   : > { %p629_p4 = pnand %p628_p8, %p627_p7 }
  0x1e   : > { %p630_p9 = pneg %p629_p4 }
  0x20   : > { %p635_p11 = pnand %p633_p10, %p630_p9 }
  0x22   : > { %638 = shalt.err (!%p635_p11)
}
  0x23   : > { %s639_s11 = scalar_lea.vmem %s189_s4, 32  ;;  %s646_s15 = scalar_lea.vmem %s189_s4, 64 }
  0x24   : > { %p640_p1 = scmp.ne.s32.totalorder %s189_s4, %s639_s11  ;;  %p647_p5 = scmp.lt.s32.totalorder %s189_s4, %s189_s4 }
  0x25   : > { %p648_p0 = scmp.lt.s32.totalorder %s646_s15, %s639_s11 }
  0x26   : > { %p642_p13 = pnand %p640_p1, %p628_p8 }
  0x27   : > { %p649_p12 = por %p648_p0, %p647_p5 }
  0x28   : > { %p643_p3 = pneg %p642_p13 }
  0x2a   : > { %p650_p6 = pnand %p649_p12, %p643_p3 }
  0x2c   : > { %653 = shalt.err (!%p650_p6)
}
  0x2d   : > { %544 = dma.hbm_to_vmem [thread:$0]  (!%p888_p2), %s1011_s0, 32, %s189_s4, [#allocation4]  }
  0x2e   : > { %p1022_p7 = scmp.lt.s32.totalorder %s787_s19, 3  ;;  %p1023_p4 = scmp.ge.s32.totalorder %s787_s19, 1 }
  0x2f   : > { %s790_s25 = smov [#allocation6]   ;;  %s654_s7 = scalar_lea.hbm %s1012_s1, 32 }
  0x30   : > { %p917_p9 = pnand %p1023_p4, %p1022_p7  ;;  %s209_s26 = sshll.u32 %s790_s25, 4  ;;  %s210_s26 = int_to_ptr.vmem [resolvable:$true] %s209_s26 }
  0x31   : > { %p655_p6 = scmp.ne.s32.totalorder %s1012_s1, %s654_s7  ;;  %p661_p0 = scmp.lt.s32.totalorder %s654_s7, %s654_s7 }
  0x32   : > { %s1024_s23 = scalar_select %p917_p9, 1, 0 }
  0x33   : > { %p657_p12 = pnand %p655_p6, %p628_p8 }
  0x35   : > { %p658_p13 = pneg %p657_p12 }
  0x37   : > { %p663_p3 = pnand %p661_p0, %p658_p13 }
  0x39   : > { %666 = shalt.err (!%p663_p3)
}
  0x3a   : > { %s667_s4 = scalar_lea.vmem %s210_s26, 32  ;;  %s674_s10 = scalar_lea.vmem %s210_s26, 64 }
  0x3b   : > { %p668_p5 = scmp.ne.s32.totalorder %s210_s26, %s667_s4  ;;  %p675_p1 = scmp.lt.s32.totalorder %s210_s26, %s210_s26 }
  0x3c   : > { %p676_p7 = scmp.lt.s32.totalorder %s674_s10, %s667_s4 }
  0x3d   : > { %p670_p10 = pnand %p668_p5, %p628_p8 }
  0x3e   : > { %p677_p4 = por %p676_p7, %p675_p1 }
  0x3f   : > { %p671_p11 = pneg %p670_p10 }
  0x41   : > { %p678_p9 = pnand %p677_p4, %p671_p11 }
  0x43   : > { %681 = shalt.err (!%p678_p9)
}
  0x44   : > { %547 = dma.hbm_to_vmem [thread:$0]  (!%p888_p2), %s1012_s1, 32, %s210_s26, [#allocation7]  }
  0x45   : > { %p1025_p6 = scmp.ne.s32.totalorder %s1024_s23, 0 }
  0x46   : > { %s233_s20 = sand.u32 (!%p1025_p6), 1, %s775_s16   ;;  %p1026_p8 = scmp.ne.s32.totalorder (!%p1025_p6), %s1018_s24, 0 }
  0x47   : > { %231 = sbr.rel (%p1025_p6) target bundleno = 320 (0x140), region = 32  ;;  %s517_s21 = sshll.u32 (!%p1025_p6), %s233_s20, 1 }
  0x48   : > { %s234_s25 = scalar_lea.sflag (!%p1025_p6), [#allocation4], %s233_s20  ;;  %s237_s30 = scalar_lea.vmem (!%p1025_p6), [#allocation3], %s517_s21 }
  0x4c   : > { %745 = dma.done.wait (%p1026_p8), %s234_s25, 32  }
  0x4d   : > { %747 = vsyncadd (%p1026_p8), %s234_s25, 4294967264  ;;  %s243_s5 = scalar_lea.sflag [#allocation7], %s233_s20  ;;  %s246_s6 = scalar_lea.vmem [#allocation6], %s517_s21 }
  0x4e   : > { %749 = dma.done.wait (%p1026_p8), %s243_s5, 32  }
  0x4f   : > { %751 = vsyncadd (%p1026_p8), %s243_s5, 4294967264  ;;  %s524_s23 = sshll.u32 %s779_s17, 1  ;;  %v307_v0 = vlaneseq  ;;  %p288_p2 = scmp.lt.s32.totalorder %s779_s17, 0  ;;  %vm319_vm1 = vcmask 25600   ;;  %v312_v4 = vld [vmem:[%s237_s30] sm:$0x3] }
  0x50   : > { %v309_v1 = vstv %s524_s23  ;;  %v314_v5 = vld [vmem:[%s246_s6] sm:$0x3]  ;;  %s278_s4 = sand.u32 1, %s763_s13   ;;  %s528_s15 = sshll.u32 %s779_s17, 7 }
  0x51   : > { %v951_v2 = vshrl.u32 %v307_v0, 7  ;;  %s289_s26 = scalar_select %p288_p2, %s779_s17, 0 }
  0x52   : > { %s519_s10 = sshll.u32 %s278_s4, 3  ;;  %s382_s17 = scalar_lea.sflag [#allocation5], %s278_s4 }
  0x53   : > { %v310_v3 = vadd.s32 %v309_v1, %v951_v2  ;;  %s1039_s26 = smov (!%p288_p2, %s289_s26), 0  ;;  %vm375_vm2 = vcmp.eq.s32.totalorder %v951_v2, 1  ;;  %s280_s30 = scalar_lea.vmem [#allocation8], %s519_s10  ;;  %vm374_vm3 = vcmp.eq.s32.totalorder %v951_v2, 0 }
  0x54   : > { %s523_s7 = sshll.u32 %s1039_s26, 1  ;;  %s395_s5 = sshll.u32 %s280_s30, 4  ;;  %s396_s5 = int_to_ptr.vmem [resolvable:$true] %s395_s5 }
  0x55   : > { %vm311_vm0 = vcmp.lt.s32.totalorder %v310_v3, 2  ;;  %s293_s9 = scalar_lea.vmem %s1013_s2, %s523_s7  ;;  %s965_s26 = scalar_lea.hbm %s1014_s3, %s528_s15 }
  0x56   : > { %v313_v6 = vsel %vm311_vm0, %v312_v4, 0  ;;  %v315_v7 = vld [vmem:[%s293_s9] sm:$0x3]  ;;  %s682_s7 = scalar_lea.vmem %s396_s5, 128  ;;  %p1027_p12 = scmp.ne.s32.totalorder %s1019_s28, 0 }
  0x57   : > { %v320_v8 = vsel %vm319_vm1, %v313_v6, 0  ;;  %v316_v9 = vadd.s32 %v315_v7, %v314_v5  ;;  %p683_p9 = scmp.ne.s32.totalorder %s396_s5, %s682_s7  ;;  %s791_s8 = smov [#allocation8]  }
  0x58   : > { %v322_v10 = vshrl.u32 %v320_v8, 16  ;;  %v321_v11 = vand.u32 65535, %v320_v8  ;;  %s686_s24 = sshll.u32 %s791_s8, 4  ;;  %s687_s24 = int_to_ptr.vmem [resolvable:$false] %s686_s24 }
  0x59   : > { %v317_v12 = vsel %vm311_vm0, %v316_v9, 0  ;;  %p684_p13 = pnand %p683_p9, %p1027_p12  ;;  %s688_s9 = scalar_lea.vmem %s687_s24, 256 }
  0x5a   : > { %v324_v13 = vcvt.s32.f32 %v322_v10  ;;  %v323_v14 = vcvt.s32.f32 %v321_v11  ;;  %v344_v15 = vsel %vm319_vm1, %v317_v12, 0  ;;  %p689_p3 = scmp.lt.s32.totalorder %s396_s5, %s687_s24  ;;  %p690_p5 = scmp.lt.s32.totalorder %s688_s9, %s682_s7 }
  0x5b   : > { %v346_v16 = vshrl.u32 %v344_v15, 16  ;;  %v345_v17 = vand.u32 65535, %v344_v15  ;;  %p685_p0 = pneg %p684_p13 }
  0x5c   : > { %327 = vadd.xlane.f32.xlu0 %v324_v13  ;;  %325 = vadd.xlane.f32.xlu1 %v323_v14  ;;  %p691_p10 = por %p690_p5, %p689_p3 }
  0x5d   : > { %v348_v18 = vcvt.s32.f32 %v346_v16  ;;  %v347_v19 = vcvt.s32.f32 %v345_v17 }
  0x5e   : > { %p692_p11 = pnand %p691_p10, %p685_p0 }
  0x60   : > { %351 = vadd.xlane.f32.xlu0 %v348_v18  ;;  %349 = vadd.xlane.f32.xlu1 %v347_v19 }
  0xe5   : > { %v328_v20 = vpop.xlane.xlu0 %327  ;;  %v326_v21 = vpop.xlane.xlu1 %325 }
  0xe6   : > { %v330_v22 = vcvt.f32.s32 %v328_v20  ;;  %v329_v23 = vcvt.f32.s32 %v326_v21 }
  0xe8   : > { %v331_v24 = vshll.u32 %v330_v22, 16 }
  0xe9   : > { %v352_v25 = vpop.xlane.xlu0 %351  ;;  %v350_v26 = vpop.xlane.xlu1 %349 }
  0xea   : > { %v332_v27 = vadd.s32 %v331_v24, %v329_v23  ;;  %v354_v28 = vcvt.f32.s32 %v352_v25  ;;  %v353_v29 = vcvt.f32.s32 %v350_v26 }
  0xec   : > { %v333_v30 = vrot.slane %v332_v27, 4  ;;  %v355_v31 = vshll.u32 %v354_v28, 16 }
  0xee   : > { %v356_v32 = vadd.s32 %v355_v31, %v353_v29  ;;  %v334_v33 = vadd.s32 %v333_v30, %v332_v27 }
  0xf0   : > { %v357_v34 = vrot.slane %v356_v32, 4  ;;  %v335_v35 = vrot.slane %v334_v33, 2 }
  0xf2   : > { %v358_v36 = vadd.s32 %v357_v34, %v356_v32  ;;  %v336_v37 = vadd.s32 %v335_v35, %v334_v33 }
  0xf4   : > { %v337_v38 = vrot.slane %v336_v37, 1  ;;  %v359_v39 = vrot.slane %v358_v36, 2 }
  0xf6   : > { %v338_v40 = vadd.s32 %v337_v38, %v336_v37  ;;  %v360_v41 = vadd.s32 %v359_v39, %v358_v36 }
  0xf8   : > { %531 = vpush %v338_v40  ;;  %v361_v42 = vrot.slane %v360_v41, 1 }
  0xfa   : > { %v362_v43 = vadd.s32 %v361_v42, %v360_v41 }
  0xfc   : > { %533 = vpush %v362_v43 }
 0x129   : > { %s532_s11 = spop %531 }
 0x12a   : > { %s371_s20 = scvt.s32.f32 %s532_s11 }
 0x12c   : > { %v378_v45 = vstv %s371_s20 }
 0x12d   : > { %s534_s21 = spop %533 }
 0x12e   : > { %s373_s25 = scvt.s32.f32 %s534_s21 }
 0x130   : > { %v376_v44 = vstv %s373_s25 }
 0x131   : > { %v377_v46 = vsel %vm375_vm2, %v376_v44, 0.0 }
 0x132   : > { %v379_v47 = vsel %vm374_vm3, %v378_v45, %v377_v46 }
 0x133   : > { %380 = vst [vmem:[%s280_s30] sm:$0xff] %v379_v47 }
 0x134   : > { %695 = shalt.err (!%p692_p11)
}
 0x135   : > { %s696_s10 = scalar_lea.hbm %s965_s26, 128  ;;  %s700_s15 = scalar_lea.hbm %s1014_s3, 256 }
 0x136   : > { %p697_p1 = scmp.ne.s32.totalorder %s965_s26, %s696_s10  ;;  %p701_p6 = scmp.lt.s32.totalorder %s965_s26, %s1014_s3 }
 0x137   : > { %p702_p8 = scmp.lt.s32.totalorder %s700_s15, %s696_s10 }
 0x138   : > { %p698_p7 = pnand %p697_p1, %p1027_p12 }
 0x139   : > { %p703_p2 = por %p702_p8, %p701_p6 }
 0x13a   : > { %p699_p4 = pneg %p698_p7 }
 0x13c   : > { %p704_p9 = pnand %p703_p2, %p699_p4 }
 0x13e   : > { %707 = shalt.err (!%p704_p9)
}
 0x13f   : > { %539 = dma.vmem_to_hbm [thread:$0]  (%p1027_p12), %s396_s5, 128, %s965_s26, %s382_s17  }
 0x140 PF: > { %s407_s25 = sand.u32 1, %s759_s12   ;;  %p1028_p13 = scmp.ne.s32.totalorder %s1020_s29, 0 }
 0x141   : > { %p1029_p0 = scmp.ge.s32.totalorder %s787_s19, 2  ;;  %s408_s30 = scalar_lea.sflag [#allocation5], %s407_s25 }
 0x143   : > { %p549_p3 = pnand %p1029_p0, %p1028_p13 }
 0x145   : > { %p550_p5 = pneg %p549_p3 }
 0x147   : > { %753 = dma.done.wait (%p550_p5), %s408_s30, 128  }
 0x148   : > { %755 = vsyncadd (%p550_p5), %s408_s30, 4294967168  ;;  %s22_s19 = sadd.s32 1, %s787_s19   ;;  %s1030_s12 = smov %s763_s13 }
 0x149   : > { %p19_p10 = scmp.ge.s32.totalorder %s22_s19, 4   ;;  %s1031_s13 = smov %s767_s14 }
 0x14a   : > { %s1032_s14 = smov %s870_s27  ;;  %s1033_s15 = smov %s775_s16 }
 0x14b   : > { %s1001_s16 = smov 0   ;;  %s1034_s17 = smov %s783_s18 }
 0x14c   : > { %s1035_s18 = smov %s1037_s22  ;;  %21 = sbr.rel (!%p19_p10) target bundleno = 9 (0x9), region = 105 }
 0x151   :  { %413 = vsyncpa [#allocation4], 1 }
 0x152   :  { %415 = vsyncpa [#allocation4 + $0x1], 1 }
 0x153   :  { %416 = vsyncpa [#allocation7], 1 }
 0x154   :  { %418 = vsyncpa [#allocation7 + $0x1], 1 }
 0x155   :  { %419 = vsyncpa [#allocation5], 1 }
 0x156   :  { %421 = vsyncpa [#allocation5 + $0x1], 1 }

</bundles_post_ra>
